<compile_context>
chip_gen: v5e
topology: v5e:2x2
jax: 0.10.0
libtpu: 0.0.40
codegen_flags: <defaults>
</compile_context>

<pallas_src>
import functools

import jax
import jax.numpy as jnp
from jax import lax
from jax.experimental import pallas as pl
from jax.experimental.pallas import tpu as pltpu

SOFT_LOCAL_MAX_SIZE = 3  # module default; pad = 1


def _soft_detection_kernel(inv_max_ref, x_ref, inv_dw_ref, o_ref):
    # inv_max_ref: (B,) f32 SMEM, 1 / max_per_sample (inf when max == 0 ->
    #              NaN downstream, matching the PyTorch semantics).
    # x_ref:       (1, TC, H, W) channel chunk of the features.
    # inv_dw_ref:  (1, H, W) precomputed 1 / (depth_wise_max + 1e-8).
    # o_ref:       (1, 1, H, W) per-(split, sample) running max of all_scores.
    b = pl.program_id(1)
    c = pl.program_id(2)

    x = jnp.maximum(x_ref[0], 0.0)                       # relu, (TC, H, W)
    _, H, W = x.shape

    # e = exp(x / max_per_sample); reciprocal precomputed in the wrapper so
    # the VPU only sees a multiply.
    e = jnp.exp(x * inv_max_ref[b])

    # Hoisted tiny boundary masks ((1,1,W)/(1,H,1) iotas, not (TC,H,W)).
    col = lax.broadcasted_iota(jnp.int32, (1, 1, W), 2)
    row = lax.broadcasted_iota(jnp.int32, (1, H, 1), 1)
    not_first_col = col > 0
    not_last_col = col < W - 1
    not_first_row = row > 0
    not_last_row = row < H - 1

    # 3x3 window sum with constant padding 1.0
    # (== soft_local_max_size**2 * avg_pool2d(pad(e, 1, value=1.0), 3, 1)),
    # as a separable shifted sum.  pltpu.roll lowers to XLU lane/sublane
    # rotates (vector-extended slot, effectively free next to the VALU);
    # positive shifts only (shift of size-1 == roll by -1).
    left = jnp.where(not_first_col, pltpu.roll(e, shift=1, axis=2), 1.0)
    right = jnp.where(not_last_col, pltpu.roll(e, shift=W - 1, axis=2), 1.0)
    s1 = left + e + right                                # row 3-sum

    # a fully padded border row contributes 3 * 1.0 to the window sum
    up = jnp.where(not_first_row, pltpu.roll(s1, shift=1, axis=1), 3.0)
    down = jnp.where(not_last_row, pltpu.roll(s1, shift=H - 1, axis=1), 3.0)
    sum_exp = up + s1 + down                             # (TC, H, W)

    # EUP approximate reciprocal: moves the C*H*W divides off the VALU path.
    local_max_score = e * pl.reciprocal(sum_exp, approx=True)

    # depth-wise reciprocal precomputed once in the wrapper -> multiply only.
    all_scores = local_max_score * (x * inv_dw_ref[0])   # (TC, H, W)
    chunk_max = jnp.max(all_scores, axis=0)              # (H, W)

    # zero-init at c == 0, then a single unconditional max (scores are >= 0,
    # NaN from an all-negative sample still propagates as in PyTorch).
    @pl.when(c == 0)
    def _():
        o_ref[0, 0] = jnp.zeros_like(chunk_max)

    o_ref[0, 0] = jnp.maximum(o_ref[0, 0], chunk_max)


def _vmem_budget(override=None):
    """(capacity, vmem_limit_bytes) for this TPU generation."""
    cap = None
    try:
        cap = getattr(pltpu.get_tpu_info(), "vmem_capacity_bytes", None)
    except Exception:
        cap = None
    if not cap or cap <= 0:
        cap = 64 * 1024 * 1024  # conservative fallback (v7x per-core VMEM)
    if override is not None:
        return cap, int(override)
    # ~25% headroom for Mosaic internal scratch / pipelining metadata:
    # v7x (64 MiB) -> 48 MiB, v5e/v6e (128 MiB) -> 96 MiB.
    return cap, min(int(cap * 3 // 4), 100 * 1024 * 1024)


def _pick_channel_chunk(C, H, W, target_block_bytes):
    """Largest divisor of C whose (tc, H, W) f32 block stays <= target bytes."""
    per_channel = H * W * 4
    cap = max(1, target_block_bytes // per_channel)
    tc = 1
    for d in range(1, C + 1):
        if C % d == 0 and d <= cap:
            tc = d
    # TODO(synk): no spatial-tiling fallback if a single (H, W) channel plane
    # exceeds the VMEM budget (very large H, W on v7x's 64 MiB).
    return tc


@functools.partial(
    jax.jit,
    static_argnames=("target_block_bytes", "vmem_limit_bytes", "core_split"),
)
def soft_detection(batch, *, target_block_bytes=None, vmem_limit_bytes=None,
                   core_split=None):
    """batch: (B, C, H, W) float32 -> (B, H, W) float32 D2-Net soft scores."""
    B, C, H, W = batch.shape
    batch = batch.astype(jnp.float32)

    # Lane/sublane padding: W -> multiple of 128, H -> multiple of 8.
    # Zero padding is numerically exact for this head (see header comment).
    H_pad = -(-H // 8) * 8
    W_pad = -(-W // 128) * 128
    if (H_pad, W_pad) != (H, W):
        batch = jnp.pad(batch, ((0, 0), (0, 0), (0, H_pad - H), (0, W_pad - W)))

    # Cheap XLA reductions (single fused pass over the features); these make
    # channel tiling possible inside the kernel.  Reciprocals precomputed here
    # so the kernel never divides.
    relu = jnp.maximum(batch, 0.0)
    inv_max = 1.0 / jnp.max(relu, axis=(1, 2, 3))            # (B,), inf if max==0
    inv_dw = 1.0 / (jnp.max(relu, axis=1) + 1e-8)            # (B, H_pad, W_pad)

    # Per-generation chunk sizing: big chunks amortize per-step overhead and
    # DMA setup; capped so 2x double-buffered chunks fit v7x's 64 MiB VMEM.
    _, vmem_limit = _vmem_budget(vmem_limit_bytes)
    if target_block_bytes is None:
        target_block_bytes = min(max(vmem_limit // 4, 8 * 1024 * 1024),
                                 32 * 1024 * 1024)

    tc = _pick_channel_chunk(C, H_pad, W_pad, target_block_bytes)
    nc = C // tc

    # B=1 (single-image inference): split the channel reduction 2-way across a
    # leading parallel axis so both v7x TensorCores get work; the final
    # max-over-split + normalization is a tiny XLA epilogue either way.
    if core_split is None:
        core_split = 2 if (B == 1 and nc % 2 == 0) else 1
    if nc % core_split != 0:
        core_split = 1
    nc_s = nc // core_split

    partial = pl.pallas_call(
        _soft_detection_kernel,
        out_shape=jax.ShapeDtypeStruct((core_split, B, H_pad, W_pad),
                                       jnp.float32),
        grid=(core_split, B, nc_s),
        in_specs=[
            # 1/max_per_sample: tiny (B,) table, whole array in SMEM.
            pl.BlockSpec(memory_space=pltpu.MemorySpace.SMEM),
            # features: one channel chunk per grid step; split s owns channels
            # [s*nc_s*tc, (s+1)*nc_s*tc).
            pl.BlockSpec((1, tc, H_pad, W_pad),
                         lambda s, b, c: (b, s * nc_s + c, 0, 0)),
            # depth-wise reciprocal: same block for every c step (resident).
            pl.BlockSpec((1, H_pad, W_pad), lambda s, b, c: (b, 0, 0)),
        ],
        out_specs=pl.BlockSpec((1, 1, H_pad, W_pad),
                               lambda s, b, c: (s, b, 0, 0)),
        compiler_params=pltpu.CompilerParams(
            # split/batch are independent work -> shard across TensorCores;
            # C is the reduction axis and must stay ordered.
            dimension_semantics=("parallel", "parallel", "arbitrary"),
            vmem_limit_bytes=vmem_limit,
        ),
    )(inv_max, batch, inv_dw)

    # Tiny epilogue: combine core splits, drop padding, normalize per sample.
    score = jnp.max(partial, axis=0)[:, :H, :W]
    score = score / jnp.sum(score, axis=(1, 2), keepdims=True)
    return score


def _reference(batch):
    # pure-JAX re-implementation of the PyTorch SoftDetectionModule.forward
    b, c, h, w = batch.shape
    x = jnp.maximum(batch, 0.0)
    m = jnp.max(x.reshape(b, -1), axis=1).reshape(b, 1, 1, 1)
    e = jnp.exp(x / m)
    pe = jnp.pad(e, ((0, 0), (0, 0), (1, 1), (1, 1)), constant_values=1.0)
    k = SOFT_LOCAL_MAX_SIZE
    sum_exp = sum(pe[:, :, i:i + h, j:j + w] for i in range(k) for j in range(k))
    local = e / sum_exp
    dw = jnp.max(x, axis=1, keepdims=True)
    dws = x / (dw + 1e-8)
    score = jnp.max(local * dws, axis=1)
    score = score / jnp.sum(score.reshape(b, -1), axis=1).reshape(b, 1, 1)
    return score


if __name__ == "__main__":
    # Main path: B=2 (two images through the shared backbone), default tiling.
    x = jax.random.normal(jax.random.PRNGKey(0), (2, 4, 16, 16),
                          dtype=jnp.float32)
    out = jax.block_until_ready(soft_detection(x))
    ref = jax.block_until_ready(_reference(x))

    assert out.shape == (2, 16, 16)
    # each sample's score map is normalized to sum to 1
    assert jnp.allclose(jnp.sum(out, axis=(1, 2)), 1.0, rtol=1e-5, atol=1e-5)
    # the window-sum denominator uses the EUP approximate reciprocal
    # (pl.reciprocal(..., approx=True)), so tolerance is slightly looser.
    assert jnp.allclose(out, ref, rtol=1e-2, atol=1e-6), "mismatch vs reference"

    # B=1 path: forces multiple channel chunks and exercises the 2-way
    # core-split of the channel reduction (the v7x single-image case).
    x1 = jax.random.normal(jax.random.PRNGKey(1), (1, 8, 16, 16),
                           dtype=jnp.float32)
    out1 = jax.block_until_ready(
        soft_detection(x1, target_block_bytes=2 * 16 * 128 * 4))
    ref1 = jax.block_until_ready(_reference(x1))
    assert out1.shape == (1, 16, 16)
    assert jnp.allclose(jnp.sum(out1, axis=(1, 2)), 1.0, rtol=1e-5, atol=1e-5)
    assert jnp.allclose(out1, ref1, rtol=1e-2, atol=1e-6), "mismatch (B=1 split)"

    print("KERNEL_OK")
</pallas_src>

<mosaic_0001>
module attributes {stable_mosaic.version = 11 : i64} {
  func.func @_soft_detection_kernel(%arg0: i32, %arg1: i32, %arg2: i32, %arg3: memref<2xf32, #tpu.memory_space<smem>>, %arg4: memref<1x4x16x128xf32, #tpu.memory_space<vmem>>, %arg5: memref<1x16x128xf32, #tpu.memory_space<vmem>>, %arg6: memref<1x1x16x128xf32, #tpu.memory_space<vmem>>) attributes {dimension_semantics = [#tpu.dimension_semantics<parallel>, #tpu.dimension_semantics<parallel>, #tpu.dimension_semantics<arbitrary>], iteration_bounds = array<i64: 1, 2, 1>, scalar_prefetch = 0 : i64, scratch_operands = 0 : i64, tpu.core_type = #tpu.core_type<tc>, window_params = [{transform_indices = @transform_0, window_bounds = array<i64: 2>}, {transform_indices = @transform_1, window_bounds = array<i64: 1, 4, 16, 128>}, {transform_indices = @transform_2, window_bounds = array<i64: 1, 16, 128>}, {transform_indices = @transform_3, window_bounds = array<i64: 1, 1, 16, 128>}]} {
    %c0 = arith.constant 0 : index
    %c0_0 = arith.constant 0 : index
    %c0_1 = arith.constant 0 : index
    %c0_2 = arith.constant 0 : index
    %0 = vector.load %arg4[%c0, %c0_0, %c0_1, %c0_2] : memref<1x4x16x128xf32, #tpu.memory_space<vmem>>, vector<1x4x16x128xf32>
    %1 = vector.shape_cast %0 : vector<1x4x16x128xf32> to vector<4x16x128xf32>
    %cst = arith.constant 0.000000e+00 : f32
    %2 = vector.broadcast %cst : f32 to vector<4x16x128xf32>
    %3 = arith.maximumf %1, %2 : vector<4x16x128xf32>
    %4 = arith.index_cast %arg1 : i32 to index
    %5 = memref.load %arg3[%4] : memref<2xf32, #tpu.memory_space<smem>>
    %6 = vector.broadcast %5 : f32 to vector<4x16x128xf32>
    %7 = arith.mulf %3, %6 : vector<4x16x128xf32>
    %8 = math.exp %7 : vector<4x16x128xf32>
    %9 = tpu.iota {dimensions = array<i32: 2>} : vector<1x1x128xi32>
    %10 = tpu.iota {dimensions = array<i32: 1>} : vector<1x16x1xi32>
    %c0_i32 = arith.constant 0 : i32
    %11 = vector.broadcast %c0_i32 : i32 to vector<1x1x128xi32>
    %12 = arith.cmpi sgt, %9, %11 : vector<1x1x128xi32>
    %c127_i32 = arith.constant 127 : i32
    %13 = vector.broadcast %c127_i32 : i32 to vector<1x1x128xi32>
    %14 = arith.cmpi slt, %9, %13 : vector<1x1x128xi32>
    %c0_i32_3 = arith.constant 0 : i32
    %15 = vector.broadcast %c0_i32_3 : i32 to vector<1x16x1xi32>
    %16 = arith.cmpi sgt, %10, %15 : vector<1x16x1xi32>
    %c15_i32 = arith.constant 15 : i32
    %17 = vector.broadcast %c15_i32 : i32 to vector<1x16x1xi32>
    %18 = arith.cmpi slt, %10, %17 : vector<1x16x1xi32>
    %c1_i32 = arith.constant 1 : i32
    %19 = tpu.dynamic_rotate %8 by %c1_i32 dim 2 : vector<4x16x128xf32>, i32 -> vector<4x16x128xf32>
    %cst_4 = arith.constant 1.000000e+00 : f32
    %20 = vector.shape_cast %12 : vector<1x1x128xi1> to vector<1x1x128xi1>
    %21 = vector.broadcast %20 : vector<1x1x128xi1> to vector<4x16x128xi1>
    %22 = vector.broadcast %cst_4 : f32 to vector<4x16x128xf32>
    %23 = arith.select %21, %19, %22 : vector<4x16x128xi1>, vector<4x16x128xf32>
    %c127_i32_5 = arith.constant 127 : i32
    %24 = tpu.dynamic_rotate %8 by %c127_i32_5 dim 2 : vector<4x16x128xf32>, i32 -> vector<4x16x128xf32>
    %cst_6 = arith.constant 1.000000e+00 : f32
    %25 = vector.shape_cast %14 : vector<1x1x128xi1> to vector<1x1x128xi1>
    %26 = vector.broadcast %25 : vector<1x1x128xi1> to vector<4x16x128xi1>
    %27 = vector.broadcast %cst_6 : f32 to vector<4x16x128xf32>
    %28 = arith.select %26, %24, %27 : vector<4x16x128xi1>, vector<4x16x128xf32>
    %29 = arith.addf %23, %8 : vector<4x16x128xf32>
    %30 = arith.addf %29, %28 : vector<4x16x128xf32>
    %c1_i32_7 = arith.constant 1 : i32
    %31 = tpu.dynamic_rotate %30 by %c1_i32_7 dim 1 : vector<4x16x128xf32>, i32 -> vector<4x16x128xf32>
    %cst_8 = arith.constant 3.000000e+00 : f32
    %32 = vector.shape_cast %16 : vector<1x16x1xi1> to vector<1x16x1xi1>
    %33 = vector.broadcast %32 : vector<1x16x1xi1> to vector<4x16x128xi1>
    %34 = vector.broadcast %cst_8 : f32 to vector<4x16x128xf32>
    %35 = arith.select %33, %31, %34 : vector<4x16x128xi1>, vector<4x16x128xf32>
    %c15_i32_9 = arith.constant 15 : i32
    %36 = tpu.dynamic_rotate %30 by %c15_i32_9 dim 1 : vector<4x16x128xf32>, i32 -> vector<4x16x128xf32>
    %cst_10 = arith.constant 3.000000e+00 : f32
    %37 = vector.shape_cast %18 : vector<1x16x1xi1> to vector<1x16x1xi1>
    %38 = vector.broadcast %37 : vector<1x16x1xi1> to vector<4x16x128xi1>
    %39 = vector.broadcast %cst_10 : f32 to vector<4x16x128xf32>
    %40 = arith.select %38, %36, %39 : vector<4x16x128xi1>, vector<4x16x128xf32>
    %41 = arith.addf %35, %30 : vector<4x16x128xf32>
    %42 = arith.addf %41, %40 : vector<4x16x128xf32>
    %43 = tpu.reciprocal %42 {approx = true} : vector<4x16x128xf32> -> vector<4x16x128xf32>
    %44 = arith.mulf %8, %43 : vector<4x16x128xf32>
    %c0_11 = arith.constant 0 : index
    %c0_12 = arith.constant 0 : index
    %c0_13 = arith.constant 0 : index
    %45 = vector.load %arg5[%c0_11, %c0_12, %c0_13] : memref<1x16x128xf32, #tpu.memory_space<vmem>>, vector<1x16x128xf32>
    %46 = vector.shape_cast %45 : vector<1x16x128xf32> to vector<16x128xf32>
    %47 = vector.shape_cast %46 : vector<16x128xf32> to vector<1x16x128xf32>
    %48 = vector.broadcast %47 : vector<1x16x128xf32> to vector<4x16x128xf32>
    %49 = arith.mulf %3, %48 : vector<4x16x128xf32>
    %50 = arith.mulf %44, %49 : vector<4x16x128xf32>
    %cst_14 = arith.constant dense<0xFF800000> : vector<16x128xf32>
    %51 = vector.multi_reduction <maximumf>, %50, %cst_14 [0] : vector<4x16x128xf32> to vector<16x128xf32>
    %c0_i32_15 = arith.constant 0 : i32
    %52 = arith.cmpi eq, %arg2, %c0_i32_15 : i32
    %53 = arith.extui %52 : i1 to i32
    %c0_i32_16 = arith.constant 0 : i32
    %54 = arith.cmpi ne, %53, %c0_i32_16 : i32
    scf.if %54 {
      %cst_25 = arith.constant 0.000000e+00 : f32
      %61 = vector.broadcast %cst_25 : f32 to vector<16x128xf32>
      %c0_26 = arith.constant 0 : index
      %c0_27 = arith.constant 0 : index
      %c0_28 = arith.constant 0 : index
      %c0_29 = arith.constant 0 : index
      %62 = vector.load %arg6[%c0_26, %c0_27, %c0_28, %c0_29] : memref<1x1x16x128xf32, #tpu.memory_space<vmem>>, vector<1x1x16x128xf32>
      %63 = vector.shape_cast %62 : vector<1x1x16x128xf32> to vector<16x128xf32>
      %64 = vector.shape_cast %61 : vector<16x128xf32> to vector<1x1x16x128xf32>
      tpu.vector_store %arg6[%c0_26, %c0_27, %c0_28, %c0_29], %64 {strides = array<i32>} : memref<1x1x16x128xf32, #tpu.memory_space<vmem>>, vector<1x1x16x128xf32>,
    } else {
    }
    %c0_17 = arith.constant 0 : index
    %c0_18 = arith.constant 0 : index
    %c0_19 = arith.constant 0 : index
    %c0_20 = arith.constant 0 : index
    %55 = vector.load %arg6[%c0_17, %c0_18, %c0_19, %c0_20] : memref<1x1x16x128xf32, #tpu.memory_space<vmem>>, vector<1x1x16x128xf32>
    %56 = vector.shape_cast %55 : vector<1x1x16x128xf32> to vector<16x128xf32>
    %57 = arith.maximumf %56, %51 : vector<16x128xf32>
    %c0_21 = arith.constant 0 : index
    %c0_22 = arith.constant 0 : index
    %c0_23 = arith.constant 0 : index
    %c0_24 = arith.constant 0 : index
    %58 = vector.load %arg6[%c0_21, %c0_22, %c0_23, %c0_24] : memref<1x1x16x128xf32, #tpu.memory_space<vmem>>, vector<1x1x16x128xf32>
    %59 = vector.shape_cast %58 : vector<1x1x16x128xf32> to vector<16x128xf32>
    %60 = vector.shape_cast %57 : vector<16x128xf32> to vector<1x1x16x128xf32>
    tpu.vector_store %arg6[%c0_21, %c0_22, %c0_23, %c0_24], %60 {strides = array<i32>} : memref<1x1x16x128xf32, #tpu.memory_space<vmem>>, vector<1x1x16x128xf32>,
    return
  }
  func.func @transform_0(%arg0: i32, %arg1: i32, %arg2: i32) -> i32 {
    %c0_i32 = arith.constant 0 : i32
    %c0_i32_0 = arith.constant 0 : i32
    return %c0_i32 : i32
  }
  func.func @transform_1(%arg0: i32, %arg1: i32, %arg2: i32) -> (i32, i32, i32, i32) {
    %c1_i32 = arith.constant 1 : i32
    %0 = arith.muli %arg0, %c1_i32 : i32
    %1 = arith.addi %0, %arg2 : i32
    %c0_i32 = arith.constant 0 : i32
    %c0_i32_0 = arith.constant 0 : i32
    %c0_i32_1 = arith.constant 0 : i32
    return %arg1, %1, %c0_i32, %c0_i32_0 : i32, i32, i32, i32
  }
  func.func @transform_2(%arg0: i32, %arg1: i32, %arg2: i32) -> (i32, i32, i32) {
    %c0_i32 = arith.constant 0 : i32
    %c0_i32_0 = arith.constant 0 : i32
    %c0_i32_1 = arith.constant 0 : i32
    return %arg1, %c0_i32, %c0_i32_0 : i32, i32, i32
  }
  func.func @transform_3(%arg0: i32, %arg1: i32, %arg2: i32) -> (i32, i32, i32, i32) {
    %c0_i32 = arith.constant 0 : i32
    %c0_i32_0 = arith.constant 0 : i32
    %c0_i32_1 = arith.constant 0 : i32
    return %arg0, %arg1, %c0_i32, %c0_i32_0 : i32, i32, i32, i32
  }
}

</mosaic_0001>

<bundles_post_ra>
// kernel: soft_detection.1
= control target key start
LH: loop header
LB: loop body
LE: loop exit
PB: predicated region body
PF: predicated region fallthrough
CT: control target
= control target key end

     0   :  { %8 = vsyncpa [#allocation3], 0  ;;  %s781_s12 = smov 0   ;;  %s783_s13 = smov 0   ;;  %s1036_s0 = inlined_call_operand.vmem [shape: f32[2], index: 0, kind: input, shape index: {}]   ;;  %s1037_s1 = inlined_call_operand.vmem [shape: f32[2,4,16,128], index: 1, kind: input, shape index: {}]   ;;  %s1038_s2 = inlined_call_operand.vmem [shape: f32[2,16,128], index: 2, kind: input, shape index: {}]   ;;  %s1039_s3 = inlined_call_operand.vmem [shape: f32[1,2,16,128], index: 3, kind: output, shape index: {}]  }
   0x1   :  { %s785_s14 = smov 0  }
   0x2 LB: > { %s627_s15 = sadd.s32 4294967295, %s756_s14   ;;  %s29_s16 = sadd.s32 1, %s752_s13  ;;  %s756_s14 = sphi %s785_s14, %s14_s14   ;;  %s752_s13 = sphi %s783_s13, %s1041_s13   ;;  %s748_s12 = sphi %s781_s12, %s1040_s12  }
   0x3   : > { %p31_p0 = scmp.ge.s32.totalorder %s29_s16, 2  ;;  %p629_p1 = scmp.ge.s32.totalorder %s756_s14, 1 }
   0x4   : > { %p143_p2 = scmp.lt.s32.totalorder %s756_s14, 3  ;;  %p653_p4 = scmp.eq.s32.totalorder %s627_s15, 0 }
   0x5   : > { %s1043_s16 = smov (%p31_p0, %s29_s16), 0  ;;  %s155_s19 = sshll.u32 %s1036_s0, 4  ;;  %s156_s19 = int_to_ptr.vmem [resolvable:$true] %s155_s19 }
   0x6   : > { %p144_p3 = pnand %p629_p1, %p143_p2  ;;  %s758_s20 = smov [#allocation2]  }
   0x8   : > { %p649_p5 = pneg %p144_p3  ;;  %192 = sbr.rel (%p144_p3) target bundleno = 220 (0xdc), region = 32 }
   0xa   : > { %p650_p6 = pnand %p653_p4, %p649_p5 }
   0xc   : > { %652 = dma.vmem_to_smem (!%p650_p6), %s156_s19, 16, %s758_s20, [#allocation3]  }
   0xd   : > { %743 = dma.done.wait (%p653_p4), [#allocation3], 16  }
   0xe   : > { %745 = vsyncadd (%p653_p4), [#allocation3], 4294967280 }
   0xf   : > { %199 = sfence }
  0x10   : > { %p235_p7 = scmp.lt.s32.totalorder %s748_s12, 1  ;;  %s276_s21 = sld [smem:[#allocation2 + %s748_s12]]  ;;  %v302_v46 = vlaneseq }
  0x11   : > { %s759_s26 = smov 1   ;;  %s760_s27 = smov 127  }
  0x12   : > { %s1045_s12 = smov (!%p235_p7, %s748_s12), 1  ;;  %v881_v49 = vand.u32 127, %v302_v46  ;;  %v898_v61 = vshrl.u32 %v302_v46, 7 }
  0x13   : > { %s642_s22 = sshll.u32 %s1045_s12, 6  ;;  %s643_s28 = sshll.u32 %s1045_s12, 4 }
  0x14   : > { %s243_s25 = scalar_lea.vmem %s1037_s1, %s642_s22  ;;  %vm307_vm0 = vcmp.gt.s32.totalorder %v881_v49, 0  ;;  %vm308_vm1 = vcmp.lt.s32.totalorder %v881_v49, 127  ;;  %vm389_vm2 = vcmp.lt.s32.totalorder %v898_v61, 1  ;;  %vm309_vm3 = vcmp.gt.s32.totalorder %v898_v61, 0  ;;  %s250_s4 = scalar_lea.vmem %s1038_s2, %s643_s28 }
  0x15   : > { %v809_v0 = vld [vmem:[%s243_s25 + $0x10] sm:$0xff]  ;;  %v811_v2 = vld [vmem:[%s243_s25] sm:$0xff]  ;;  %v813_v3 = vld [vmem:[%s243_s25 + $0x18] sm:$0xff]  ;;  %vm418_vm4 = vcmp.lt.s32.totalorder %v898_v61, 7  ;;  %s259_s7 = scalar_lea.vmem %s1039_s3, %s643_s28 }
  0x16   : > { %v277_v1 = vstv %s276_s21  ;;  %v270_v4 = vmax.f32 %v809_v0, 0.0  ;;  %v268_v5 = vmax.f32 %v811_v2, 0.0  ;;  %v271_v6 = vmax.f32 %v813_v3, 0.0  ;;  %v818_v7 = vld [vmem:[%s243_s25 + $0x8] sm:$0xff]  ;;  %v820_v8 = vld [vmem:[%s243_s25 + $0x20] sm:$0xff]  ;;  %v837_v20 = vld [vmem:[%s243_s25 + $0x38] sm:$0xff] }
  0x17   : > { %v269_v9 = vmax.f32 %v818_v7, 0.0  ;;  %v272_v10 = vmax.f32 %v820_v8, 0.0  ;;  %v824_v11 = vld [vmem:[%s243_s25 + $0x28] sm:$0xff]  ;;  %v839_v22 = vld [vmem:[%s243_s25 + $0x30] sm:$0xff]  ;;  %v275_v24 = vmax.f32 %v837_v20, 0.0 }
  0x18   : > { %v280_v12 = vmul.f32 %v277_v1, %v270_v4  ;;  %v278_v13 = vmul.f32 %v277_v1, %v268_v5  ;;  %v281_v17 = vmul.f32 %v277_v1, %v271_v6  ;;  %v273_v18 = vmax.f32 %v824_v11, 0.0 }
  0x19   : > { %v282_v14 = vmul.f32 %v277_v1, %v272_v10  ;;  %v279_v19 = vmul.f32 %v277_v1, %v269_v9  ;;  %v274_v27 = vmax.f32 %v839_v22, 0.0  ;;  %v285_v29 = vmul.f32 %v277_v1, %v275_v24 }
  0x1a   : > { %v290_v15 = vmul.f32 1.442695, %v280_v12  ;;  %v286_v16 = vmul.f32 1.442695, %v278_v13  ;;  %v292_v23 = vmul.f32 1.442695, %v281_v17  ;;  %v283_v25 = vmul.f32 %v277_v1, %v273_v18 }
  0x1b   : > { %v294_v21 = vmul.f32 1.442695, %v282_v14  ;;  %v288_v26 = vmul.f32 1.442695, %v279_v19  ;;  %v284_v32 = vmul.f32 %v277_v1, %v274_v27  ;;  %v300_v34 = vmul.f32 1.442695, %v285_v29 }
  0x1c   : > { %683 = vpow2.f32 %v290_v15  ;;  %v296_v30 = vmul.f32 1.442695, %v283_v25  ;;  %v916_v25 = vadd.s32 8, %v898_v61 }
  0x1d   : > { %685 = vpow2.f32 %v286_v16  ;;  %v298_v35 = vmul.f32 1.442695, %v284_v32 }
  0x1e   : > { %687 = vpow2.f32 %v294_v21  ;;  %vm312_vm5 = vcmp.lt.s32.totalorder %v916_v25, 15 }
  0x1f   : > { %689 = vpow2.f32 %v292_v23 }
  0x20   : > { %691 = vpow2.f32 %v288_v26 }
  0x21   : > { %693 = vpow2.f32 %v296_v30 }
  0x22   : > { %v845_v28 = vpop.eup %683  ;;  %695 = vpow2.f32 %v300_v34 }
  0x23   : > { %v849_v31 = vpop.eup %685  ;;  %317 = vrot.lane.b32.xlu1 %v845_v28, %s759_s26  ;;  %697 = vpow2.f32 %v298_v35 }
  0x24   : > { %313 = vrot.lane.b32.xlu0 %v849_v31, %s759_s26  ;;  %v855_v33 = vpop.eup %687 }
  0x25   : > { %321 = vrot.lane.b32.xlu2 %v855_v33, %s759_s26  ;;  %v858_v36 = vpop.eup %689 }
  0x26   : > { %v860_v37 = vpop.eup %691 }
  0x27   : > { %v863_v38 = vpop.eup %693 }
  0x28   : > { %v867_v39 = vpop.eup %695 }
  0x29   : > { %v869_v40 = vpop.eup %697 }
  0x2b   : > { %319 = vrot.lane.b32.xlu1 %v858_v36, %s759_s26 }
  0x2c   : > { %315 = vrot.lane.b32.xlu0 %v860_v37, %s759_s26 }
  0x2d   : > { %323 = vrot.lane.b32.xlu2 %v863_v38, %s759_s26 }
  0x33   : > { %327 = vrot.lane.b32.xlu1 %v867_v39, %s759_s26 }
  0x34   : > { %325 = vrot.lane.b32.xlu0 %v869_v40, %s759_s26 }
  0x35   : > { %339 = vrot.lane.b32.xlu2 %v849_v31, %s760_s27 }
  0x3b   : > { %343 = vrot.lane.b32.xlu1 %v845_v28, %s760_s27 }
  0x3c   : > { %341 = vrot.lane.b32.xlu0 %v860_v37, %s760_s27 }
  0x3d   : > { %345 = vrot.lane.b32.xlu2 %v858_v36, %s760_s27 }
  0x43   : > { %349 = vrot.lane.b32.xlu1 %v863_v38, %s760_s27 }
  0x44   : > { %347 = vrot.lane.b32.xlu0 %v855_v33, %s760_s27 }
  0x45   : > { %351 = vrot.lane.b32.xlu2 %v869_v40, %s760_s27 }
  0x4c   : > { %353 = vrot.lane.b32.xlu0 %v867_v39, %s760_s27 }
  0x7f   : > { %v322_v41 = vpop.permute.xlu2 %321 }
  0x80   : > { %v335_v17 = vsel %vm307_vm0, %v322_v41, 1.0 }
  0x81   : > { %v369_v32 = vadd.f32 %v855_v33, %v335_v17 }
  0x87   : > { %v324_v42 = vpop.permute.xlu2 %323 }
  0x88   : > { %v336_v19 = vsel %vm307_vm0, %v324_v42, 1.0 }
  0x89   : > { %v370_v34 = vadd.f32 %v863_v38, %v336_v19 }
  0x8f   : > { %v340_v48 = vpop.permute.xlu2 %339 }
  0x90   : > { %v357_v63 = vsel %vm308_vm1, %v340_v48, 1.0 }
  0x95   : > { %v318_v43 = vpop.permute.xlu1 %317 }
  0x96   : > { %v314_v44 = vpop.permute.xlu0 %313  ;;  %v333_v54 = vsel %vm307_vm0, %v318_v43, 1.0 }
  0x97   : > { %v346_v53 = vpop.permute.xlu2 %345  ;;  %v331_v55 = vsel %vm307_vm0, %v314_v44, 1.0  ;;  %v367_v59 = vadd.f32 %v845_v28, %v333_v54 }
  0x98   : > { %v360_v58 = vsel %vm308_vm1, %v346_v53, 1.0  ;;  %v365_v60 = vadd.f32 %v849_v31, %v331_v55 }
  0x9a   : > { %v913_v23 = vadd.f32 %v365_v60, %v357_v63 }
  0x9d   : > { %v320_v45 = vpop.permute.xlu1 %319 }
  0x9e   : > { %v316_v47 = vpop.permute.xlu0 %315  ;;  %v334_v52 = vsel %vm307_vm0, %v320_v45, 1.0  ;;  %v381_v45 = vrot.slane %v913_v23, 7 }
  0x9f   : > { %v368_v56 = vadd.f32 %v858_v36, %v334_v52  ;;  %v332_v57 = vsel %vm307_vm0, %v316_v47, 1.0  ;;  %v352_v35 = vpop.permute.xlu2 %351  ;;  %v410_v52 = vrot.slane %v913_v23, 1 }
  0xa0   : > { %v366_v1 = vadd.f32 %v860_v37, %v332_v57  ;;  %v363_v53 = vsel %vm308_vm1, %v352_v35, 1.0 }
  0xa1   : > { %v376_v12 = vadd.f32 %v368_v56, %v360_v58 }
  0xa3   : > { %v386_v29 = vrot.slane %v376_v12, 7  ;;  %v415_v41 = vrot.slane %v376_v12, 1 }
  0xa5   : > { %v328_v50 = vpop.permute.xlu1 %327 }
  0xa6   : > { %v326_v51 = vpop.permute.xlu0 %325 }
  0xa7   : > { %v337_v42 = vsel %vm307_vm0, %v326_v51, 1.0  ;;  %v338_v51 = vsel %vm307_vm0, %v328_v50, 1.0 }
  0xa8   : > { %v371_v56 = vadd.f32 %v869_v40, %v337_v42 }
  0xad   : > { %v344_v62 = vpop.permute.xlu1 %343 }
  0xae   : > { %v359_v13 = vsel %vm308_vm1, %v344_v62, 1.0  ;;  %v342_v14 = vpop.permute.xlu0 %341 }
  0xaf   : > { %v375_v15 = vadd.f32 %v367_v59, %v359_v13  ;;  %v358_v16 = vsel %vm308_vm1, %v342_v14, 1.0 }
  0xb0   : > { %v911_v21 = vadd.f32 %v366_v1, %v358_v16  ;;  %v372_v1 = vadd.f32 %v867_v39, %v338_v51 }
  0xb1   : > { %v382_v26 = vrot.slane %v375_v15, 7  ;;  %v411_v30 = vrot.slane %v375_v15, 1 }
  0xb2   : > { %v385_v44 = vrot.slane %v911_v21, 7  ;;  %v414_v47 = vrot.slane %v911_v21, 1 }
  0xb3   : > { %v395_v43 = vsel %vm389_vm2, %v386_v29, %v382_v26  ;;  %v391_v46 = vsel %vm389_vm2, %v382_v26, %v386_v29  ;;  %v424_v54 = vsel %vm418_vm4, %v415_v41, %v411_v30  ;;  %v379_v29 = vadd.f32 %v371_v56, %v363_v53 }
  0xb4   : > { %v404_v57 = vsel %vm309_vm3, %v395_v43, 3.0  ;;  %v442_v60 = vadd.f32 %v391_v46, %v376_v12  ;;  %v394_v50 = vsel %vm389_vm2, %v385_v44, %v381_v45  ;;  %v434_v13 = vsel %vm312_vm5, %v424_v54, 3.0 }
  0xb5   : > { %v350_v48 = vpop.permute.xlu1 %349  ;;  %v390_v14 = vsel %vm389_vm2, %v381_v45, %v385_v44  ;;  %v423_v16 = vsel %vm418_vm4, %v414_v47, %v410_v52  ;;  %v441_v17 = vadd.f32 %v404_v57, %v375_v15 }
  0xb6   : > { %v348_v55 = vpop.permute.xlu0 %347  ;;  %v362_v58 = vsel %vm308_vm1, %v350_v48, 1.0  ;;  %v450_v42 = vadd.f32 %v442_v60, %v434_v13  ;;  %v432_v43 = vsel %vm312_vm5, %v423_v16, 3.0  ;;  %v440_v45 = vadd.f32 %v390_v14, %v911_v21 }
  0xb7   : > { %v361_v59 = vsel %vm308_vm1, %v348_v55, 1.0  ;;  %v378_v62 = vadd.f32 %v370_v34, %v362_v58  ;;  %v420_v34 = vsel %vm418_vm4, %v411_v30, %v415_v41  ;;  %v419_v60 = vsel %vm418_vm4, %v410_v52, %v414_v47 }
  0xb8   : > { %v377_v63 = vadd.f32 %v369_v32, %v361_v59  ;;  %v402_v32 = vsel %vm309_vm3, %v394_v50, 3.0  ;;  %v449_v48 = vadd.f32 %v441_v17, %v420_v34  ;;  %699 = vrcp.f32 %v450_v42 }
  0xb9   : > { %v387_v19 = vrot.slane %v378_v62, 7  ;;  %v416_v26 = vrot.slane %v378_v62, 1  ;;  %v439_v51 = vadd.f32 %v402_v32, %v913_v23  ;;  %v448_v23 = vadd.f32 %v440_v45, %v432_v43 }
  0xba   : > { %v383_v12 = vrot.slane %v377_v63, 7  ;;  %v412_v35 = vrot.slane %v377_v63, 1  ;;  %v384_v50 = vrot.slane %v379_v29, 7  ;;  %701 = vrcp.f32 %v449_v48 }
  0xbb   : > { %v413_v13 = vrot.slane %v379_v29, 1 }
  0xbc   : > { %v392_v44 = vsel %vm389_vm2, %v383_v12, %v387_v19  ;;  %v396_v15 = vsel %vm389_vm2, %v387_v19, %v383_v12  ;;  %v425_v30 = vsel %vm418_vm4, %v416_v26, %v412_v35  ;;  %v421_v56 = vsel %vm418_vm4, %v412_v35, %v416_v26 }
  0xbd   : > { %v406_v46 = vsel %vm309_vm3, %v396_v15, 3.0  ;;  %v444_v41 = vadd.f32 %v392_v44, %v378_v62  ;;  %v436_v53 = vsel %vm312_vm5, %v425_v30, 3.0  ;;  %v447_v62 = vadd.f32 %v439_v51, %v419_v60  ;;  %v471_v44 = vld [vmem:[%s250_s4] sm:$0xff]  ;;  %v472_v15 = vld [vmem:[%s250_s4 + $0x8] sm:$0xff] }
  0xbe   : > { %v443_v54 = vadd.f32 %v406_v46, %v377_v63  ;;  %v354_v55 = vpop.permute.xlu0 %353  ;;  %v700_v26 = vpop.eup %699  ;;  %v478_v45 = vmul.f32 %v472_v15, %v273_v18  ;;  %v475_v61 = vmul.f32 %v471_v44, %v270_v4  ;;  %v474_v30 = vmul.f32 %v472_v15, %v269_v9 }
  0xbf   : > { %v452_v21 = vadd.f32 %v444_v41, %v436_v53  ;;  %v364_v57 = vsel %vm308_vm1, %v354_v55, 1.0  ;;  %v477_v41 = vmul.f32 %v471_v44, %v272_v10  ;;  %v466_v51 = vmul.f32 %v700_v26, %v858_v36 }
  0xc0   : > { %v451_v58 = vadd.f32 %v443_v54, %v421_v56  ;;  %v380_v59 = vadd.f32 %v372_v1, %v364_v57  ;;  %v702_v32 = vpop.eup %701  ;;  %v476_v11 = vmul.f32 %v472_v15, %v271_v6  ;;  %v480_v18 = vmul.f32 %v472_v15, %v275_v24 }
  0xc1   : > { %703 = vrcp.f32 %v452_v21  ;;  %v465_v4 = vmul.f32 %v702_v32, %v845_v28  ;;  %v473_v7 = vmul.f32 %v471_v44, %v268_v5  ;;  %v479_v9 = vmul.f32 %v471_v44, %v274_v27 }
  0xc2   : > { %v388_v63 = vrot.slane %v380_v59, 7  ;;  %v417_v14 = vrot.slane %v380_v59, 1  ;;  %705 = vrcp.f32 %v451_v58  ;;  %v484_v36 = vmul.f32 %v476_v11, %v466_v51 }
  0xc3   : > { %707 = vrcp.f32 %v448_v23  ;;  %v483_v28 = vmul.f32 %v475_v61, %v465_v4 }
  0xc4   : > { %v393_v49 = vsel %vm389_vm2, %v384_v50, %v388_v63  ;;  %v397_v1 = vsel %vm389_vm2, %v388_v63, %v384_v50  ;;  %v426_v52 = vsel %vm418_vm4, %v417_v14, %v413_v13  ;;  %709 = vrcp.f32 %v447_v62 }
  0xc5   : > { %v408_v47 = vsel %vm309_vm3, %v397_v1, 3.0  ;;  %v446_v16 = vadd.f32 %v393_v49, %v380_v59  ;;  %v438_v17 = vsel %vm312_vm5, %v426_v52, 3.0  ;;  %v422_v12 = vsel %vm418_vm4, %v413_v13, %v417_v14 }
  0xc6   : > { %v445_v19 = vadd.f32 %v408_v47, %v379_v29 }
  0xc7   : > { %v454_v34 = vadd.f32 %v446_v16, %v438_v17  ;;  %v704_v42 = vpop.eup %703 }
  0xc8   : > { %v453_v35 = vadd.f32 %v445_v19, %v422_v12  ;;  %v706_v43 = vpop.eup %705  ;;  %v468_v46 = vmul.f32 %v704_v42, %v863_v38 }
  0xc9   : > { %711 = vrcp.f32 %v454_v34  ;;  %v708_v25 = vpop.eup %707  ;;  %v467_v48 = vmul.f32 %v706_v43, %v855_v33 }
  0xca   : > { %713 = vrcp.f32 %v453_v35  ;;  %v710_v29 = vpop.eup %709  ;;  %v464_v53 = vmul.f32 %v708_v25, %v860_v37  ;;  %v486_v33 = vmul.f32 %v478_v45, %v468_v46 }
  0xcb   : > { %v463_v8 = vmul.f32 %v710_v29, %v849_v31  ;;  %v485_v6 = vmul.f32 %v477_v41, %v467_v48 }
  0xcc   : > { %v482_v24 = vmul.f32 %v474_v30, %v464_v53 }
  0xcd   : > { %v481_v38 = vmul.f32 %v473_v7, %v463_v8 }
  0xce   : > { %v492_v5 = vmax.f32 %v482_v24, %v486_v33 }
  0xcf   : > { %v712_v0 = vpop.eup %711  ;;  %v489_v31 = vmax.f32 %v481_v38, %v485_v6 }
  0xd0   : > { %v714_v10 = vpop.eup %713  ;;  %v470_v3 = vmul.f32 %v712_v0, %v867_v39 }
  0xd1   : > { %v469_v20 = vmul.f32 %v714_v10, %v869_v40 }
  0xd2   : > { %v488_v37 = vmul.f32 %v480_v18, %v470_v3 }
  0xd3   : > { %v487_v2 = vmul.f32 %v479_v9, %v469_v20 }
  0xd4   : > { %v493_v54 = vmax.f32 %v484_v36, %v488_v37 }
  0xd5   : > { %v490_v55 = vmax.f32 %v483_v28, %v487_v2 }
  0xd6   : > { %v494_v22 = vmax.f32 %v492_v5, %v493_v54 }
  0xd7   : > { %v491_v27 = vmax.f32 %v489_v31, %v490_v55 }
  0xd8   : > { %v504_v39 = vmax.f32 %v494_v22, 0.0 }
  0xd9   : > { %v503_v56 = vmax.f32 %v491_v27, 0.0 }
  0xda   : > { %506 = vst [vmem:[%s259_s7 + $0x8] sm:$0xff] %v504_v39 }
  0xdb   : > { %505 = vst [vmem:[%s259_s7] sm:$0xff] %v503_v56 }
  0xdc PF: > { %s14_s14 = sadd.s32 1, %s756_s14   ;;  %s1040_s12 = smov %s752_s13 }
  0xdd   : > { %p11_p8 = scmp.ge.s32.totalorder %s14_s14, 4   ;;  %s1041_s13 = smov %s1043_s16 }
  0xdf   :  { %13 = sbr.rel (!%p11_p8) target bundleno = 2 (0x2), region = 74 }
  0xe4   :  { %536 = vsyncpa [#allocation3], 1 }
  0xe5   :  { %538 = vsyncpa [#allocation3 + $0x1], 1 }

</bundles_post_ra>
